<compile_context>
chip_gen: v7x
topology: tpu7x:2x2x1
jax: 0.10.0
libtpu: 0.0.40
codegen_flags: <defaults>
</compile_context>

<pallas_src>
import jax
import jax.numpy as jnp
from jax.experimental import pallas as pl
from jax.experimental.pallas import tpu as pltpu


def _crelu_kernel(x_ref, o_ref):
    # x_ref: (1, TR, L) input block ; o_ref: (1, 2, TR, L) output block.
    x = x_ref[0]
    o_ref[0, 0, :, :] = jnp.maximum(x, 0)    # relu(x)   -> first half of channels
    o_ref[0, 1, :, :] = jnp.maximum(-x, 0)   # relu(-x)  -> second half of channels


def _choose_layout(f: int, itemsize: int):
    """Pick (L, R, TR): lane width L (multiple of 128 when possible),
    rows R = f // L, and row-tile TR sized for ~1 MiB of input per grid step."""
    if f % 128 != 0:
        # TODO(synk): pad to a multiple of 128 for full lane density; this
        # fallback (one whole-sample block, last dim == full dim) is correct
        # but uses masked stores.
        return f, 1, 1

    lane = None
    # Prefer a lane width that still leaves >= 8 sublane rows (dense vregs).
    for cand in (512, 1024, 2048, 256, 128):
        if f % cand == 0 and f // cand >= 8:
            lane = cand
            break
    if lane is None:
        for cand in (1024, 512, 256, 128):
            if f % cand == 0:
                lane = cand
                break
    rows = f // lane

    # Sublane packing multiple for this dtype (8 for f32, 16 for bf16, 32 for int8).
    sub = 8 * max(1, 4 // itemsize)
    target_rows = max(1, (1 << 20) // (lane * itemsize))   # ~1 MiB of input per block
    if target_rows >= rows:
        tile_rows = rows                     # whole sample in one block
    else:
        tile_rows = max(sub, (target_rows // sub) * sub)
        tile_rows = min(tile_rows, rows)
    return lane, rows, tile_rows


def crelu(x_nchw: jax.Array) -> jax.Array:
    """CReLU: concat(relu(x), relu(-x)) along channel dim. Input NCHW."""
    n, c, h, w = x_nchw.shape
    f = c * h * w
    itemsize = jnp.dtype(x_nchw.dtype).itemsize
    L, R, TR = _choose_layout(f, itemsize)

    x_view = x_nchw.reshape(n, R, L)         # contiguous view of flattened sample

    out = pl.pallas_call(
        _crelu_kernel,
        out_shape=jax.ShapeDtypeStruct((n, 2, R, L), x_nchw.dtype),
        grid=(n, pl.cdiv(R, TR)),
        in_specs=[pl.BlockSpec((1, TR, L), lambda i, j: (i, j, 0))],
        out_specs=pl.BlockSpec((1, 2, TR, L), lambda i, j: (i, 0, j, 0)),
        compiler_params=pltpu.CompilerParams(
            dimension_semantics=("parallel", "parallel"),
        ),
    )(x_view)

    # (n, 2, R, L) has the same memory order as (n, 2, c, h, w); flattening the
    # (2, c) axes gives exactly torch.cat((relu(x), relu(-x)), dim=1).
    return out.reshape(n, 2 * c, h, w)


if __name__ == "__main__":
    key = jax.random.PRNGKey(0)
    # Small NCHW input consistent with the module's forward.
    x = jax.random.normal(key, (2, 4, 16, 16), dtype=jnp.float32)

    out = jax.block_until_ready(crelu(x))

    # Reference: same semantics as torch.cat((relu(x), relu(-x)), dim=1).
    ref = jnp.concatenate([jnp.maximum(x, 0), jnp.maximum(-x, 0)], axis=1)
    assert out.shape == (2, 8, 16, 16), out.shape
    assert out.dtype == x.dtype
    assert jnp.allclose(out, ref), "mismatch vs reference"

    print("KERNEL_OK")
</pallas_src>

<mosaic_0001>
module attributes {stable_mosaic.version = 11 : i64} {
  func.func @_crelu_kernel(%arg0: i32, %arg1: i32, %arg2: memref<1x8x128xf32, #tpu.memory_space<vmem>>, %arg3: memref<1x2x8x128xf32, #tpu.memory_space<vmem>>) attributes {dimension_semantics = [#tpu.dimension_semantics<parallel>, #tpu.dimension_semantics<parallel>], iteration_bounds = array<i64: 2, 1>, scalar_prefetch = 0 : i64, scratch_operands = 0 : i64, tpu.core_type = #tpu.core_type<tc>, window_params = [{transform_indices = @transform_0, window_bounds = array<i64: 1, 8, 128>}, {transform_indices = @transform_1, window_bounds = array<i64: 1, 2, 8, 128>}]} {
    %c0 = arith.constant 0 : index
    %c0_0 = arith.constant 0 : index
    %c0_1 = arith.constant 0 : index
    %0 = vector.load %arg2[%c0, %c0_0, %c0_1] : memref<1x8x128xf32, #tpu.memory_space<vmem>>, vector<1x8x128xf32>
    %1 = vector.shape_cast %0 : vector<1x8x128xf32> to vector<8x128xf32>
    %cst = arith.constant 0.000000e+00 : f32
    %2 = vector.broadcast %cst : f32 to vector<8x128xf32>
    %3 = arith.maximumf %1, %2 : vector<8x128xf32>
    %c0_2 = arith.constant 0 : index
    %c0_3 = arith.constant 0 : index
    %c0_4 = arith.constant 0 : index
    %c0_5 = arith.constant 0 : index
    %4 = vector.load %arg3[%c0_2, %c0_3, %c0_4, %c0_5] : memref<1x2x8x128xf32, #tpu.memory_space<vmem>>, vector<1x1x8x128xf32>
    %5 = vector.shape_cast %4 : vector<1x1x8x128xf32> to vector<8x128xf32>
    %6 = vector.shape_cast %3 : vector<8x128xf32> to vector<1x1x8x128xf32>
    tpu.vector_store %arg3[%c0_2, %c0_3, %c0_4, %c0_5], %6 {strides = array<i32>} : memref<1x2x8x128xf32, #tpu.memory_space<vmem>>, vector<1x1x8x128xf32>,
    %cst_6 = arith.constant 0.000000e+00 : f32
    %7 = vector.broadcast %cst_6 : f32 to vector<8x128xf32>
    %8 = arith.subf %7, %1 : vector<8x128xf32>
    %cst_7 = arith.constant 0.000000e+00 : f32
    %9 = vector.broadcast %cst_7 : f32 to vector<8x128xf32>
    %10 = arith.maximumf %8, %9 : vector<8x128xf32>
    %c0_8 = arith.constant 0 : index
    %c1 = arith.constant 1 : index
    %c0_9 = arith.constant 0 : index
    %c0_10 = arith.constant 0 : index
    %11 = vector.load %arg3[%c0_8, %c1, %c0_9, %c0_10] : memref<1x2x8x128xf32, #tpu.memory_space<vmem>>, vector<1x1x8x128xf32>
    %12 = vector.shape_cast %11 : vector<1x1x8x128xf32> to vector<8x128xf32>
    %13 = vector.shape_cast %10 : vector<8x128xf32> to vector<1x1x8x128xf32>
    tpu.vector_store %arg3[%c0_8, %c1, %c0_9, %c0_10], %13 {strides = array<i32>} : memref<1x2x8x128xf32, #tpu.memory_space<vmem>>, vector<1x1x8x128xf32>,
    return
  }
  func.func @transform_0(%arg0: i32, %arg1: i32) -> (i32, i32, i32) {
    %c0_i32 = arith.constant 0 : i32
    %c0_i32_0 = arith.constant 0 : i32
    return %arg0, %arg1, %c0_i32 : i32, i32, i32
  }
  func.func @transform_1(%arg0: i32, %arg1: i32) -> (i32, i32, i32, i32) {
    %c0_i32 = arith.constant 0 : i32
    %c0_i32_0 = arith.constant 0 : i32
    %c0_i32_1 = arith.constant 0 : i32
    return %arg0, %c0_i32, %arg1, %c0_i32_0 : i32, i32, i32, i32
  }
}

</mosaic_0001>

<bundles_post_ra>
// kernel: tpu_custom_call.1
= control target key start
LH: loop header
LB: loop body
LE: loop exit
PB: predicated region body
PF: predicated region fallthrough
CT: control target
= control target key end

     0   :  { %6 = vsyncpa [#allocation3], 0  ;;  %s638_s0 = inlined_call_operand.hbm [shape: f32[2,8,128], index: 0, kind: input, shape index: {}]   ;;  %s639_s1 = inlined_call_operand.hbm [shape: f32[2,2,8,128], index: 1, kind: output, shape index: {}]  }
   0x1   :  { %8 = vsyncpa [#allocation3 + $0x1], 0 }
   0x2   :  { %9 = vsyncpa [#allocation4], 0 }
   0x3   :  { %11 = vsyncpa [#allocation4 + $0x1], 0  ;;  %s463_s6 = smov 0   ;;  %s465_s7 = smov 0  }
   0x4   :  { %s467_s8 = smov 0   ;;  %s469_s9 = smov 0  }
   0x5   :  { %s471_s10 = smov 0   ;;  %s473_s11 = smov 0  }
   0x6 LB: > { %s255_s12 = sadd.s32 4294967295, %s447_s11   ;;  %s256_s13 = sadd.s32 4294967294, %s447_s11   ;;  %s447_s11 = sphi %s473_s11, %s17_s11   ;;  %s443_s10 = sphi %s471_s10, %s655_s10   ;;  %s439_s9 = sphi %s469_s9, %s654_s9   ;;  %s435_s8 = sphi %s467_s8, %s653_s8   ;;  %s431_s7 = sphi %s465_s7, %s652_s7   ;;  %s427_s6 = sphi %s463_s6, %s651_s6  }
   0x7   : > { %s29_s14 = sadd.s32 1, %s443_s10  ;;  %s38_s15 = sadd.s32 1, %s435_s8 }
   0x8   : > { %p31_p0 = scmp.ge.s32.totalorder %s29_s14, 2  ;;  %p45_p1 = scmp.ne.s32.totalorder %s435_s8, %s431_s7 }
   0x9   : > { %p46_p2 = scmp.eq.s32.totalorder %s447_s11, 0  ;;  %p51_p3 = scmp.ne.s32.totalorder %s431_s7, %s427_s6 }
   0xa   : > { %s657_s14 = smov (%p31_p0, %s29_s14), 0  ;;  %p52_p5 = scmp.eq.s32.totalorder %s255_s12, 0 }
   0xb   : > { %p504_p4 = por %p46_p2, %p45_p1  ;;  %s33_s17 = ssub.s32 %s443_s10, %s657_s14 }
   0xc   : > { %p77_p6 = scmp.eq.s32.totalorder %s255_s12, 1  ;;  %p36_p7 = scmp.eq.s32.totalorder %s33_s17, 0 }
   0xd   : > { %p510_p8 = por %p52_p5, %p51_p3  ;;  %p83_p10 = scmp.eq.s32.totalorder %s256_s13, 1 }
   0xe   : > { %p514_p9 = por %p77_p6, %p45_p1  ;;  %p283_p13 = scmp.lt.s32.totalorder %s447_s11, 2 }
   0xf   : > { %s519_s20 = scalar_select %p36_p7, %s435_s8, %s38_s15  }
  0x10   : > { %s643_s19 = scalar_select %p514_p9, 1, 0 }
  0x11   : > { %p521_p11 = por %p83_p10, %p51_p3  ;;  %s103_s22 = sand.u32 1, %s435_s8  }
  0x12   : > { %s259_s23 = sshll.u32 %s103_s22, 3  ;;  %s260_s24 = sshll.u32 %s443_s10, 7 }
  0x13   : > { %s644_s21 = scalar_select %p521_p11, 1, 0 }
  0x14   : > { %s532_s27 = scalar_lea.hbm %s638_s0, %s260_s24  ;;  %s107_s28 = scalar_lea.vmem [#allocation2], %s259_s23 }
  0x15   : > { %s115_s29 = sshll.u32 %s107_s28, 4  ;;  %p538_p0 = pnand %p283_p13, %p504_p4  ;;  %s534_s29 = int_to_ptr.vmem [resolvable:$true] %s115_s29 }
  0x16   : > { %s104_s2 = scalar_lea.sflag [#allocation3], %s103_s22  ;;  %s335_s3 = scalar_lea.hbm %s532_s27, 128 }
  0x17   : > { %p336_p3 = scmp.ne.s32.totalorder %s532_s27, %s335_s3  ;;  %p337_p5 = pneg %p538_p0 }
  0x18   : > { %s340_s12 = scalar_lea.hbm %s638_s0, 256  ;;  %p341_p4 = scmp.lt.u32.totalorder %s532_s27, %s638_s0 }
  0x19   : > { %p338_p6 = pnand %p337_p5, %p336_p3  ;;  %p342_p10 = scmp.lt.u32.totalorder %s340_s12, %s335_s3 }
  0x1a   : > { %p344_p12 = scmp.lt.u32.totalorder %s335_s3, %s532_s27 }
  0x1b   : > { %p339_p7 = pneg %p338_p6  ;;  %p343_p13 = por %p342_p10, %p341_p4 }
  0x1d   : > { %p345_p1 = por %p344_p12, %p343_p13 }
  0x1f   : > { %p346_p2 = pnand %p345_p1, %p339_p7 }
  0x21   : > { %349 = shalt.err (!%p346_p2)
}
  0x22   : > { %s350_s16 = scalar_lea.vmem %s534_s29, 128  ;;  %s449_s17 = smov [#allocation2]  }
  0x23   : > { %p351_p3 = scmp.ne.s32.totalorder %s534_s29, %s350_s16  ;;  %s355_s22 = sshll.u32 %s449_s17, 4  ;;  %s356_s22 = int_to_ptr.vmem [resolvable:$false] %s355_s22 }
  0x24   : > { %s357_s23 = scalar_lea.vmem %s356_s22, 256  ;;  %p358_p9 = scmp.lt.s32.totalorder %s534_s29, %s356_s22 }
  0x25   : > { %p353_p6 = pnand %p351_p3, %p337_p5  ;;  %p359_p4 = scmp.lt.s32.totalorder %s357_s23, %s350_s16 }
  0x27   : > { %p354_p11 = pneg %p353_p6  ;;  %p360_p10 = por %p359_p4, %p358_p9 }
  0x29   : > { %p361_p12 = pnand %p360_p10, %p354_p11 }
  0x2b   : > { %364 = shalt.err (!%p361_p12)
}
  0x2c   : > { %278 = dma.hbm_to_vmem [thread:$0]  (!%p538_p0), %s532_s27, 128, %s534_s29, %s104_s2  }
  0x2d   : > { %p646_p1 = scmp.lt.s32.totalorder %s447_s11, 3  ;;  %p647_p2 = scmp.ge.s32.totalorder %s447_s11, 1 }
  0x2f   : > { %p121_p5 = pnand %p647_p2, %p646_p1 }
  0x30   : > { %s574_s24 = sand.u32 (!%p121_p5), 1, %s431_s7  }
  0x31   : > { %124 = sbr.rel (%p121_p5) target bundleno = 84 (0x54), region = 24  ;;  %s262_s25 = sshll.u32 (!%p121_p5), %s574_s24, 3 }
  0x32   : > { %s127_s26 = scalar_lea.sflag (!%p121_p5), [#allocation3], %s574_s24  ;;  %s130_s28 = scalar_lea.vmem (!%p121_p5), [#allocation2], %s262_s25 }
  0x38   : > { %418 = dma.done.wait (%p510_p8), %s127_s26, 128  }
  0x39   : > { %420 = vsyncadd (%p510_p8), %s127_s26, 4294967168  ;;  %s263_s27 = sshll.u32 %s574_s24, 4  ;;  %s270_s2 = sshll.u32 %s439_s9, 8  ;;  %v149_v0 = vld [vmem:[%s130_s28] sm:$0xff] }
  0x3a   : > { %s148_s29 = scalar_lea.vmem [#allocation5], %s263_s27  ;;  %v150_v1 = vmax.f32 %v149_v0, 0.0  ;;  %v152_v2 = vsub.f32 0.0, %v149_v0  ;;  %s589_s18 = scalar_lea.hbm %s639_s1, %s270_s2 }
  0x3b   : > { %s171_s30 = sshll.u32 %s148_s29, 4  ;;  %s157_s5 = scalar_lea.sflag [#allocation4], %s574_s24  ;;  %s584_s30 = int_to_ptr.vmem [resolvable:$true] %s171_s30 }
  0x3c   : > { %151 = vst [vmem:[%s148_s29] sm:$0xff] %v150_v1  ;;  %v153_v3 = vmax.f32 %v152_v2, 0.0  ;;  %s365_s12 = scalar_lea.vmem %s584_s30, 256  ;;  %p648_p9 = scmp.ne.s32.totalorder %s643_s19, 0 }
  0x3d   : > { %p366_p8 = scmp.ne.s32.totalorder %s584_s30, %s365_s12  ;;  %s450_s9 = smov [#allocation5]  }
  0x3e   : > { %264 = vst [vmem:[%s148_s29 + $0x8] sm:$0xff] %v153_v3  ;;  %s369_s13 = sshll.u32 %s450_s9, 4  ;;  %s370_s13 = int_to_ptr.vmem [resolvable:$false] %s369_s13 }
  0x3f   : > { %p367_p11 = pnand %p366_p8, %p648_p9  ;;  %s371_s15 = scalar_lea.vmem %s370_s13, 512 }
  0x40   : > { %p372_p7 = scmp.lt.s32.totalorder %s584_s30, %s370_s13  ;;  %p373_p13 = scmp.lt.s32.totalorder %s371_s15, %s365_s12 }
  0x41   : > { %p368_p0 = pneg %p367_p11 }
  0x42   : > { %p374_p3 = por %p373_p13, %p372_p7 }
  0x44   : > { %p375_p6 = pnand %p374_p3, %p368_p0 }
  0x46   : > { %378 = shalt.err (!%p375_p6)
}
  0x47   : > { %s379_s16 = scalar_lea.hbm %s589_s18, 256  ;;  %s383_s23 = scalar_lea.hbm %s639_s1, 512 }
  0x48   : > { %p380_p4 = scmp.ne.s32.totalorder %s589_s18, %s379_s16  ;;  %p384_p1 = scmp.lt.u32.totalorder %s589_s18, %s639_s1 }
  0x49   : > { %p385_p2 = scmp.lt.u32.totalorder %s383_s23, %s379_s16  ;;  %p387_p8 = scmp.lt.u32.totalorder %s379_s16, %s589_s18 }
  0x4a   : > { %p381_p10 = pnand %p380_p4, %p648_p9 }
  0x4b   : > { %p386_p5 = por %p385_p2, %p384_p1 }
  0x4c   : > { %p382_p12 = pneg %p381_p10 }
  0x4d   : > { %p388_p11 = por %p387_p8, %p386_p5 }
  0x4f   : > { %p389_p0 = pnand %p388_p11, %p382_p12 }
  0x51   : > { %392 = shalt.err (!%p389_p0)
}
  0x52   : > { %s451_s28 = smov 128   ;;  %s452_s27 = smov 8  }
  0x53   : > { %273 = dma.vmem_to_hbm [thread:$0]  (%p648_p9), %s584_s30, 256, %s589_s18, %s157_s5, %s451_s28, %s451_s28, %s452_s27  }
  0x54 PF: > { %s186_s29 = sand.u32 1, %s427_s6   ;;  %p649_p7 = scmp.ne.s32.totalorder %s644_s21, 0 }
  0x55   : > { %p650_p13 = scmp.ge.s32.totalorder %s447_s11, 2  ;;  %s187_s2 = scalar_lea.sflag [#allocation4], %s186_s29 }
  0x57   : > { %p280_p3 = pnand %p650_p13, %p649_p7 }
  0x59   : > { %422 = dma.done.wait (!%p280_p3), %s187_s2, 256  }
  0x5a   : > { %424 = vsyncadd (!%p280_p3), %s187_s2, 4294967040  ;;  %s17_s11 = sadd.s32 1, %s447_s11   ;;  %s651_s6 = smov %s431_s7 }
  0x5b   : > { %p14_p6 = scmp.ge.s32.totalorder %s17_s11, 4   ;;  %s652_s7 = smov %s435_s8 }
  0x5c   : > { %s653_s8 = smov %s519_s20  ;;  %s654_s9 = smov %s443_s10 }
  0x5d   : > { %s655_s10 = smov %s657_s14  ;;  %16 = sbr.rel (!%p14_p6) target bundleno = 6 (0x6), region = 70 }
  0x64   :  { %192 = vsyncpa [#allocation3], 1 }
  0x65   :  { %194 = vsyncpa [#allocation3 + $0x1], 1 }
  0x66   :  { %195 = vsyncpa [#allocation4], 1 }
  0x67   :  { %197 = vsyncpa [#allocation4 + $0x1], 1 }

</bundles_post_ra>
